<compile_context>
chip_gen: v6e
topology: v6e:2x2x1
jax: 0.10.0
libtpu: 0.0.40
codegen_flags: <defaults>
</compile_context>

<pallas_src>
import jax
import jax.numpy as jnp
from jax.experimental import pallas as pl
from jax.experimental.pallas import tpu as pltpu

PAD_IDX = 0
START_IDX = 1
END_IDX = 2


def _round_up(x, m):
    return ((x + m - 1) // m) * m


def _pad_to(x, shape):
    pads = [(0, s - d) for d, s in zip(x.shape, shape)]
    if all(p == (0, 0) for p in pads):
        return x
    return jnp.pad(x, pads)


# ----------------------------------------------------------------------------
# Generic tiled matmul + bias kernel: C = A @ B + bias, f32 accumulation.
# Used for: gx_word precompute, gx_enc (pooled @ Wx_enc + b_x), and the vocab
# classifier hoisted out of the GRU time loop.
# ----------------------------------------------------------------------------
def _matmul_bias_kernel(a_ref, b_ref, bias_ref, o_ref):
    o_ref[...] = (
        jnp.dot(a_ref[...], b_ref[...], preferred_element_type=jnp.float32)
        + bias_ref[...]
    )


def matmul_bias(a, b, bias, tm_max=128, tn_max=512):
    M, K = a.shape
    K2, Nc = b.shape
    assert K == K2
    tm = min(tm_max, _round_up(M, 8))
    tn = min(tn_max, _round_up(Nc, 128))
    Mp = _round_up(M, tm)
    Np = _round_up(Nc, tn)
    a_p = _pad_to(a, (Mp, K))
    b_p = _pad_to(b, (K, Np))
    bias_p = _pad_to(bias.reshape(1, -1).astype(jnp.float32), (1, Np))
    out = pl.pallas_call(
        _matmul_bias_kernel,
        out_shape=jax.ShapeDtypeStruct((Mp, Np), jnp.float32),
        grid_spec=pltpu.PrefetchScalarGridSpec(
            num_scalar_prefetch=0,
            grid=(Mp // tm, Np // tn),
            in_specs=[
                pl.BlockSpec((tm, K), lambda i, j: (i, 0)),
                pl.BlockSpec((K, tn), lambda i, j: (0, j)),
                pl.BlockSpec((1, tn), lambda i, j: (0, j)),
            ],
            out_specs=pl.BlockSpec((tm, tn), lambda i, j: (i, j)),
        ),
        compiler_params=pltpu.CompilerParams(
            dimension_semantics=("parallel", "parallel")
        ),
    )(a_p, b_p, bias_p)
    return out[:M, :Nc]


# ----------------------------------------------------------------------------
# Encoder kernel: linear projection (bf16 MXU, f32 acc) + ReLU + masked mean
# pool, fused. Processes 8 batch elements per grid step -> 8*T matmul rows.
# ----------------------------------------------------------------------------
def _encoder_kernel(feats_ref, w_ref, b_ref, lens_ref, emb_ref, pooled_ref):
    nb, T, Df = feats_ref.shape
    x = feats_ref[...].reshape(nb * T, Df)                       # (nb*T, Df) bf16
    emb = jnp.dot(x, w_ref[...], preferred_element_type=jnp.float32) + b_ref[...]
    emb = jnp.maximum(emb, 0.0)                                  # ReLU, f32
    emb3 = emb.reshape(nb, T, emb.shape[-1])
    emb_ref[...] = emb3                                          # audio_embeds block

    lens = lens_ref[...]                                         # (nb, 1) int32
    t_ids = jax.lax.broadcasted_iota(jnp.int32, emb3.shape, 1)
    mask = (t_ids < lens[:, :, None]).astype(jnp.float32)
    denom = jnp.maximum(lens, 1).astype(jnp.float32)             # (nb, 1)
    pooled_ref[...] = jnp.sum(emb3 * mask, axis=1) / denom       # (nb, E)


def encoder_forward(feats_p, lens2d, w_enc, b_enc, nb=8):
    Npad, T, Dfp = feats_p.shape
    Ep = w_enc.shape[1]
    grid_spec = pltpu.PrefetchScalarGridSpec(
        num_scalar_prefetch=0,
        grid=(Npad // nb,),
        in_specs=[
            pl.BlockSpec((nb, T, Dfp), lambda i: (i, 0, 0)),
            pl.BlockSpec((Dfp, Ep), lambda i: (0, 0)),
            pl.BlockSpec((1, Ep), lambda i: (0, 0)),
            pl.BlockSpec((nb, 1), lambda i: (i, 0)),
        ],
        out_specs=[
            pl.BlockSpec((nb, T, Ep), lambda i: (i, 0, 0)),
            pl.BlockSpec((nb, Ep), lambda i: (i, 0)),
        ],
    )
    audio_embeds, pooled = pl.pallas_call(
        _encoder_kernel,
        out_shape=(
            jax.ShapeDtypeStruct((Npad, T, Ep), jnp.float32),
            jax.ShapeDtypeStruct((Npad, Ep), jnp.float32),
        ),
        grid_spec=grid_spec,
        compiler_params=pltpu.CompilerParams(dimension_semantics=("parallel",)),
    )(feats_p, w_enc, b_enc, lens2d)
    return audio_embeds, pooled


# ----------------------------------------------------------------------------
# GRU recurrence kernel. Input gate pre-activations (word + pooled encoder,
# incl. b_x) are precomputed outside; only h @ Wh_all (fused [H,3H]) runs in
# the sequential loop. Grid = (batch_blocks "parallel", time "arbitrary").
# ----------------------------------------------------------------------------
def _gru_kernel(gx_ref, gxe_ref, h0_ref, wh_ref, bh_ref, hseq_ref, h_scr):
    t = pl.program_id(1)

    @pl.when(t == 0)
    def _():
        h_scr[...] = h0_ref[...]

    h = h_scr[...]                                               # (nb, H) f32
    Hp = h.shape[-1]
    gh = jnp.dot(h, wh_ref[...], preferred_element_type=jnp.float32) + bh_ref[...]
    gx = gx_ref[0] + gxe_ref[...]                                # (nb, 3H)

    r = jax.nn.sigmoid(gx[:, :Hp] + gh[:, :Hp])
    z = jax.nn.sigmoid(gx[:, Hp:2 * Hp] + gh[:, Hp:2 * Hp])
    n = jnp.tanh(gx[:, 2 * Hp:] + r * gh[:, 2 * Hp:])
    h_new = (1.0 - z) * n + z * h

    h_scr[...] = h_new
    hseq_ref[0] = h_new


def gru_forward(gx_seq, gx_enc, h0, w_h, b_h, nb=8):
    L, Npad, H3 = gx_seq.shape
    Hp = h0.shape[1]
    NB = Npad // nb
    grid_spec = pltpu.PrefetchScalarGridSpec(
        num_scalar_prefetch=0,
        grid=(NB, L),
        in_specs=[
            pl.BlockSpec((1, nb, H3), lambda b, t: (t, b, 0)),
            pl.BlockSpec((nb, H3), lambda b, t: (b, 0)),
            pl.BlockSpec((nb, Hp), lambda b, t: (b, 0)),
            pl.BlockSpec((Hp, H3), lambda b, t: (0, 0)),
            pl.BlockSpec((1, H3), lambda b, t: (0, 0)),
        ],
        out_specs=pl.BlockSpec((1, nb, Hp), lambda b, t: (t, b, 0)),
        scratch_shapes=[pltpu.VMEM((nb, Hp), jnp.float32)],
    )
    return pl.pallas_call(
        _gru_kernel,
        out_shape=jax.ShapeDtypeStruct((L, Npad, Hp), jnp.float32),
        grid_spec=grid_spec,
        compiler_params=pltpu.CompilerParams(
            dimension_semantics=("parallel", "arbitrary")
        ),
    )(gx_seq, gx_enc, h0, w_h, b_h)


# ----------------------------------------------------------------------------
# CaptionModel wrapper (teacher-forcing train_forward path, ss_ratio == 1)
# ----------------------------------------------------------------------------
class CaptionModelPallas:
    pad_idx = PAD_IDX
    start_idx = START_IDX
    end_idx = END_IDX
    max_length = 20

    def __init__(self, params, vocab_size):
        self.vocab_size = vocab_size
        self.d_feat, self.e = params["w_enc"].shape
        self.ew = params["w_x_word"].shape[0]
        self.h = params["w_h"].shape[0]
        self.v = vocab_size
        assert params["w_out"].shape == (self.h, self.v)
        # use_hidden compatibility: decoder init state = pooled encoder embedding
        assert self.e == self.h, "enc_mem_size must equal decoder hidden size"

        self.dfp = _round_up(self.d_feat, 128)
        self.ep = _round_up(self.e, 128)
        self.ewp = _round_up(self.ew, 128)
        self.hp = _round_up(self.h, 128)
        self.vp = _round_up(self.v, 128)

        f32, bf16 = jnp.float32, jnp.bfloat16
        self.w_enc_p = _pad_to(params["w_enc"], (self.dfp, self.ep)).astype(bf16)
        self.b_enc_p = _pad_to(params["b_enc"].reshape(1, -1), (1, self.ep)).astype(f32)
        self.emb_p = _pad_to(params["embedding"], (self.vp, self.ewp)).astype(bf16)
        self.w_xw_p = self._pad_gate_mat(params["w_x_word"], self.ewp).astype(bf16)
        self.w_xe_p = self._pad_gate_mat(params["w_x_enc"], self.ep).astype(bf16)
        self.b_x_p = self._pad_gate_vec(params["b_x"]).astype(f32)
        # recurrent weights stay f32: tiny, latency-bound, preserves state precision
        self.w_h_p = self._pad_gate_mat(params["w_h"], self.hp).astype(f32)
        self.b_h_p = self._pad_gate_vec(params["b_h"]).astype(f32)
        self.w_out_p = _pad_to(params["w_out"], (self.hp, self.vp)).astype(bf16)
        self.b_out_p = _pad_to(params["b_out"].reshape(1, -1), (1, self.vp)).astype(f32)

    def _pad_gate_mat(self, w, d_pad):
        D, g, H = w.shape
        assert g == 3 and H == self.h
        w = jnp.pad(w, ((0, d_pad - D), (0, 0), (0, self.hp - H)))
        return w.reshape(d_pad, 3 * self.hp)

    def _pad_gate_vec(self, b):
        b = jnp.pad(b, ((0, 0), (0, self.hp - b.shape[1])))
        return b.reshape(1, 3 * self.hp)

    def _prepare_output(self, N, output, max_length):
        output["seqs"] = jnp.full((N, max_length), self.end_idx, dtype=jnp.int32)
        output["logits"] = jnp.zeros((N, max_length, self.vocab_size), jnp.float32)
        output["sampled_logprobs"] = jnp.zeros((N, max_length), jnp.float32)

    def forward(self, feats, feat_lens, caps, cap_lens, ss_ratio=1.0):
        assert ss_ratio == 1.0  # TODO(synk): scheduled-sampling stepwise path not translated
        N, T, _ = feats.shape
        Np = _round_up(N, 8)
        L = caps.shape[1] - 1

        # ---- encoder: projection + ReLU + masked mean pool (fused kernel) ----
        feats_p = _pad_to(feats, (Np, T, self.dfp)).astype(jnp.bfloat16)
        lens2d = _pad_to(feat_lens.astype(jnp.int32).reshape(-1, 1), (Np, 1))
        _audio_embeds, pooled = encoder_forward(
            feats_p, lens2d, self.w_enc_p, self.b_enc_p
        )

        # ---- decoder input-gate precompute (hoisted out of the recurrence) ----
        # time-invariant pooled contribution (includes b_x): [Np, 3H]
        gx_enc = matmul_bias(pooled.astype(jnp.bfloat16), self.w_xe_p, self.b_x_p)
        # word contribution for all timesteps in one parallel matmul
        words = _pad_to(caps[:, :-1].astype(jnp.int32), (Np, L))     # teacher forcing
        word_emb = jnp.take(self.emb_p, words, axis=0)               # [Np, L, Ewp] bf16
        word_tm = jnp.transpose(word_emb, (1, 0, 2)).reshape(L * Np, self.ewp)
        gx_word = matmul_bias(
            word_tm, self.w_xw_p, jnp.zeros((3 * self.hp,), jnp.float32)
        )
        gx_seq = gx_word.reshape(L, Np, 3 * self.hp)                 # [L, Np, 3H]

        # ---- GRU recurrence (only h @ Wh_all inside the sequential loop) ----
        h0 = pooled                                                  # [Np, Hp] (E == H)
        h_seq = gru_forward(gx_seq, gx_enc, h0, self.w_h_p, self.b_h_p)  # [L, Np, Hp]

        # ---- vocab classifier, hoisted out of the time loop ----
        h_flat = h_seq.reshape(L * Np, self.hp).astype(jnp.bfloat16)
        logits_flat = matmul_bias(h_flat, self.w_out_p, self.b_out_p)    # [L*Np, Vp]
        logits = logits_flat.reshape(L, Np, self.vp)
        logits = jnp.transpose(logits, (1, 0, 2))[:N, :, : self.v]       # [N, L, V]

        output = {}
        self._prepare_output(N, output, L)
        output["logits"] = logits
        output["states"] = h_seq[L - 1][:N, : self.h][None]              # [1, N, H]
        return output


# ----------------------------------------------------------------------------
# Deterministic parameter init + demo run
# ----------------------------------------------------------------------------
def make_params(key, d_feat, emb_dim, hidden, word_emb_dim, vocab_size):
    ks = jax.random.split(key, 10)
    s = 0.1
    return {
        "w_enc": jax.random.normal(ks[0], (d_feat, emb_dim), jnp.float32) * s,
        "b_enc": jax.random.normal(ks[1], (emb_dim,), jnp.float32) * s,
        "embedding": jax.random.normal(ks[2], (vocab_size, word_emb_dim), jnp.float32) * s,
        "w_x_word": jax.random.normal(ks[3], (word_emb_dim, 3, hidden), jnp.float32) * s,
        "w_x_enc": jax.random.normal(ks[4], (emb_dim, 3, hidden), jnp.float32) * s,
        "b_x": jax.random.normal(ks[5], (3, hidden), jnp.float32) * s,
        "w_h": jax.random.normal(ks[6], (hidden, 3, hidden), jnp.float32) * s,
        "b_h": jax.random.normal(ks[7], (3, hidden), jnp.float32) * s,
        "w_out": jax.random.normal(ks[8], (hidden, vocab_size), jnp.float32) * s,
        "b_out": jnp.zeros((vocab_size,), jnp.float32),
    }


if __name__ == "__main__":
    key = jax.random.PRNGKey(0)
    k_feat, k_caps, k_param = jax.random.split(key, 3)

    # small shapes (deliberately unaligned to exercise the padding path)
    N, T, D_FEAT = 2, 16, 80
    EMB = 128            # enc_mem_size == decoder hidden size (use_hidden compat)
    HIDDEN = 128
    WORD_EMB = 96
    VOCAB = 200
    CAP_MAX_LEN = 8

    feats = jax.random.normal(k_feat, (N, T, D_FEAT), jnp.float32)
    feat_lens = jnp.array([16, 11], dtype=jnp.int32)

    caps = jax.random.randint(k_caps, (N, CAP_MAX_LEN), 3, VOCAB, dtype=jnp.int32)
    caps = caps.at[:, 0].set(START_IDX)
    caps = caps.at[:, -1].set(END_IDX)
    cap_lens = jnp.array([CAP_MAX_LEN, CAP_MAX_LEN], dtype=jnp.int32)

    params = make_params(k_param, D_FEAT, EMB, HIDDEN, WORD_EMB, VOCAB)
    model = CaptionModelPallas(params, VOCAB)

    output = model.forward(feats, feat_lens, caps, cap_lens, ss_ratio=1.0)
    jax.block_until_ready(output["logits"])
    jax.block_until_ready(output["states"])

    assert output["logits"].shape == (N, CAP_MAX_LEN - 1, VOCAB)
    assert output["seqs"].shape == (N, CAP_MAX_LEN - 1)
    assert output["sampled_logprobs"].shape == (N, CAP_MAX_LEN - 1)
    assert output["states"].shape == (1, N, HIDDEN)
    print("KERNEL_OK")
</pallas_src>

<mosaic_0001>
module attributes {stable_mosaic.version = 11 : i64} {
  func.func @_encoder_kernel(%arg0: i32, %arg1: memref<8x16x128xbf16, #tpu.memory_space<vmem>>, %arg2: memref<128x128xbf16, #tpu.memory_space<vmem>>, %arg3: memref<1x128xf32, #tpu.memory_space<vmem>>, %arg4: memref<8x1xi32, #tpu.memory_space<vmem>>, %arg5: memref<8x16x128xf32, #tpu.memory_space<vmem>>, %arg6: memref<8x128xf32, #tpu.memory_space<vmem>>) attributes {dimension_semantics = [#tpu.dimension_semantics<parallel>], iteration_bounds = array<i64: 1>, scalar_prefetch = 0 : i64, scratch_operands = 0 : i64, tpu.core_type = #tpu.core_type<tc>, window_params = [{transform_indices = @transform_0, window_bounds = array<i64: 8, 16, 128>}, {pipeline_mode = #tpu.pipeline_mode<synchronous>, transform_indices = @transform_1, window_bounds = array<i64: 128, 128>}, {pipeline_mode = #tpu.pipeline_mode<synchronous>, transform_indices = @transform_2, window_bounds = array<i64: 1, 128>}, {transform_indices = @transform_3, window_bounds = array<i64: 8, 1>}, {transform_indices = @transform_4, window_bounds = array<i64: 8, 16, 128>}, {transform_indices = @transform_5, window_bounds = array<i64: 8, 128>}]} {
    %c0 = arith.constant 0 : index
    %c0_0 = arith.constant 0 : index
    %c0_1 = arith.constant 0 : index
    %0 = vector.load %arg1[%c0, %c0_0, %c0_1] : memref<8x16x128xbf16, #tpu.memory_space<vmem>>, vector<8x16x128xbf16>
    %1 = vector.shape_cast %0 : vector<8x16x128xbf16> to vector<128x128xbf16>
    %c0_2 = arith.constant 0 : index
    %c0_3 = arith.constant 0 : index
    %2 = vector.load %arg2[%c0_2, %c0_3] : memref<128x128xbf16, #tpu.memory_space<vmem>>, vector<128x128xbf16>
    %cst = arith.constant dense<0.000000e+00> : vector<128x128xf32>
    %3 = tpu.matmul %1, %2, %cst {dimension_numbers = #tpu.dot_dimension_numbers<[1], [0], [0], [1], [0, 0, 1, 1], [], []>} : vector<128x128xbf16>, vector<128x128xbf16>, vector<128x128xf32> -> vector<128x128xf32>
    %c0_4 = arith.constant 0 : index
    %c0_5 = arith.constant 0 : index
    %4 = vector.load %arg3[%c0_4, %c0_5] : memref<1x128xf32, #tpu.memory_space<vmem>>, vector<1x128xf32>
    %5 = vector.broadcast %4 : vector<1x128xf32> to vector<128x128xf32>
    %6 = arith.addf %3, %5 : vector<128x128xf32>
    %cst_6 = arith.constant 0.000000e+00 : f32
    %7 = vector.broadcast %cst_6 : f32 to vector<128x128xf32>
    %8 = arith.maximumf %6, %7 : vector<128x128xf32>
    %9 = vector.shape_cast %8 : vector<128x128xf32> to vector<8x16x128xf32>
    %c0_7 = arith.constant 0 : index
    %c0_8 = arith.constant 0 : index
    %c0_9 = arith.constant 0 : index
    %10 = vector.load %arg5[%c0_7, %c0_8, %c0_9] : memref<8x16x128xf32, #tpu.memory_space<vmem>>, vector<8x16x128xf32>
    tpu.vector_store %arg5[%c0_7, %c0_8, %c0_9], %9 {strides = array<i32>} : memref<8x16x128xf32, #tpu.memory_space<vmem>>, vector<8x16x128xf32>,
    %c0_10 = arith.constant 0 : index
    %c0_11 = arith.constant 0 : index
    %11 = vector.load %arg4[%c0_10, %c0_11] : memref<8x1xi32, #tpu.memory_space<vmem>>, vector<8x1xi32>
    %12 = tpu.iota {dimensions = array<i32: 1>} : vector<8x16x128xi32>
    %13 = vector.shape_cast %11 : vector<8x1xi32> to vector<8x1x1xi32>
    %14 = vector.broadcast %13 : vector<8x1x1xi32> to vector<8x16x128xi32>
    %15 = arith.cmpi slt, %12, %14 : vector<8x16x128xi32>
    %16 = arith.extui %15 : vector<8x16x128xi1> to vector<8x16x128xi32>
    %17 = arith.sitofp %16 : vector<8x16x128xi32> to vector<8x16x128xf32>
    %c1_i32 = arith.constant 1 : i32
    %18 = vector.broadcast %c1_i32 : i32 to vector<8x1xi32>
    %19 = arith.maxsi %11, %18 : vector<8x1xi32>
    %20 = arith.sitofp %19 : vector<8x1xi32> to vector<8x1xf32>
    %21 = arith.mulf %9, %17 : vector<8x16x128xf32>
    %cst_12 = arith.constant dense<0.000000e+00> : vector<8x128xf32>
    %22 = vector.multi_reduction <add>, %21, %cst_12 [1] : vector<8x16x128xf32> to vector<8x128xf32>
    %23 = vector.broadcast %20 : vector<8x1xf32> to vector<8x128xf32>
    %24 = arith.divf %22, %23 : vector<8x128xf32>
    %c0_13 = arith.constant 0 : index
    %c0_14 = arith.constant 0 : index
    %25 = vector.load %arg6[%c0_13, %c0_14] : memref<8x128xf32, #tpu.memory_space<vmem>>, vector<8x128xf32>
    tpu.vector_store %arg6[%c0_13, %c0_14], %24 {strides = array<i32>} : memref<8x128xf32, #tpu.memory_space<vmem>>, vector<8x128xf32>,
    return
  }
  func.func @transform_0(%arg0: i32) -> (i32, i32, i32) {
    %c0_i32 = arith.constant 0 : i32
    %c0_i32_0 = arith.constant 0 : i32
    %c0_i32_1 = arith.constant 0 : i32
    return %arg0, %c0_i32, %c0_i32_0 : i32, i32, i32
  }
  func.func @transform_1(%arg0: i32) -> (i32, i32) {
    %c0_i32 = arith.constant 0 : i32
    %c0_i32_0 = arith.constant 0 : i32
    %c0_i32_1 = arith.constant 0 : i32
    return %c0_i32, %c0_i32_0 : i32, i32
  }
  func.func @transform_2(%arg0: i32) -> (i32, i32) {
    %c0_i32 = arith.constant 0 : i32
    %c0_i32_0 = arith.constant 0 : i32
    %c0_i32_1 = arith.constant 0 : i32
    return %c0_i32, %c0_i32_0 : i32, i32
  }
  func.func @transform_3(%arg0: i32) -> (i32, i32) {
    %c0_i32 = arith.constant 0 : i32
    %c0_i32_0 = arith.constant 0 : i32
    return %arg0, %c0_i32 : i32, i32
  }
  func.func @transform_4(%arg0: i32) -> (i32, i32, i32) {
    %c0_i32 = arith.constant 0 : i32
    %c0_i32_0 = arith.constant 0 : i32
    %c0_i32_1 = arith.constant 0 : i32
    return %arg0, %c0_i32, %c0_i32_0 : i32, i32, i32
  }
  func.func @transform_5(%arg0: i32) -> (i32, i32) {
    %c0_i32 = arith.constant 0 : i32
    %c0_i32_0 = arith.constant 0 : i32
    return %arg0, %c0_i32 : i32, i32
  }
}

</mosaic_0001>

<bundles_post_ra>
// kernel: tpu_custom_call.1
= control target key start
LH: loop header
LB: loop body
LE: loop exit
PB: predicated region body
PF: predicated region fallthrough
CT: control target
= control target key end

     0   :  { %11 = vsyncpa [#allocation3], 0  ;;  %s1075_s0 = inlined_call_operand.hbm [shape: bf16[8,16,128], index: 0, kind: input, shape index: {}]   ;;  %s1076_s1 = inlined_call_operand.hbm [shape: bf16[128,128], index: 1, kind: input, shape index: {}]   ;;  %s1077_s2 = inlined_call_operand.vmem [shape: f32[1,128], index: 2, kind: input, shape index: {}]   ;;  %s1078_s3 = inlined_call_operand.vmem [shape: s32[8,1], index: 3, kind: input, shape index: {}]   ;;  %s1079_s4 = inlined_call_operand.hbm [shape: f32[8,16,128], index: 4, kind: output, shape index: {0}]   ;;  %s1080_s5 = inlined_call_operand.hbm [shape: f32[8,128], index: 5, kind: output, shape index: {1}]  }
   0x1   :  { %12 = vsyncpa [#allocation6], 0 }
   0x2   :  { %13 = vsyncpa [#allocation4], 0 }
   0x3   :  { %14 = vsyncpa [#allocation9], 0  ;;  %s875_s18 = smov [#allocation2]  }
   0x4   :  { %s20_s19 = sshll.u32 %s875_s18, 4  ;;  %s21_s19 = int_to_ptr.vmem [resolvable:$true] %s20_s19 }
   0x5   :  { %s795_s20 = scalar_lea.vmem %s21_s19, 1024  ;;  %p800_p1 = scmp.lt.s32.totalorder %s21_s19, %s21_s19 }
   0x6   :  { %p796_p0 = scmp.ne.s32.totalorder %s21_s19, %s795_s20  ;;  %p801_p2 = scmp.lt.s32.totalorder %s795_s20, %s795_s20 }
   0x8   :  { %p802_p3 = por %p801_p2, %p800_p1 }
   0xa   :  { %p803_p4 = pnand %p802_p3, %p796_p0 }
   0xc   :  { %806 = shalt.err (!%p803_p4)
}
   0xd   :  { %s876_s21 = smov 64   ;;  %s877_s22 = smov 4  }
   0xe   :  { %26 = dma.hbm_to_vmem [thread:$0]  %s1075_s0, 1024, %s21_s19, [#allocation3], %s876_s21, %s876_s21, %s877_s22  }
   0xf   :  { %s878_s25 = smov [#allocation5]  }
  0x10   :  { %s32_s26 = sshll.u32 %s878_s25, 4  ;;  %s33_s26 = int_to_ptr.vmem [resolvable:$true] %s32_s26 }
  0x11   :  { %s815_s27 = scalar_lea.vmem %s33_s26, 1024  ;;  %p820_p6 = scmp.lt.s32.totalorder %s33_s26, %s33_s26 }
  0x12   :  { %p816_p5 = scmp.ne.s32.totalorder %s33_s26, %s815_s27  ;;  %p821_p7 = scmp.lt.s32.totalorder %s815_s27, %s815_s27 }
  0x14   :  { %p822_p8 = por %p821_p7, %p820_p6 }
  0x16   :  { %p823_p9 = pnand %p822_p8, %p816_p5 }
  0x18   :  { %826 = shalt.err (!%p823_p9)
}
  0x19   :  { %38 = dma.hbm_to_vmem [thread:$0]  %s1076_s1, 1024, %s33_s26, [#allocation6], %s876_s21, %s876_s21, %s877_s22  }
  0x1a   :  { %867 = dma.done.wait [#allocation3], 1024  }
  0x1b   :  { %868 = vsyncadd [#allocation3], 4294966272 }
  0x1c   :  { %869 = dma.done.wait [#allocation6], 1024  }
  0x1d   :  { %870 = vsyncadd [#allocation6], 4294966272  ;;  %v879_v0 = vmov 0   ;;  %v754_v1 = vld [vmem:[#allocation5 + $0x38] sm:$0xff]   ;;  %v755_v2 = vld [vmem:[#allocation5 + $0x30] sm:$0xff]   ;;  %v315_v4 = vlaneseq  ;;  %v881_v63 = vmov 0.0  }
  0x1e   :  { %752 = vset.pattern.permute.xlu0 %v879_v0  ;;  %753 = vset.pattern.permute.xlu1 %v879_v0  ;;  %v756_v3 = vld [vmem:[#allocation5 + $0x28] sm:$0xff]   ;;  %v880_v5 = vmov 1966171168   ;;  %v757_v7 = vld [vmem:[#allocation5 + $0x20] sm:$0xff]   ;;  %v758_v12 = vld [vmem:[#allocation5 + $0x18] sm:$0xff]  }
  0x1f   :  { %693 = vmatprep.subr.bf16.mxu0 %v754_v1  ;;  %725 = vmatprep.subr.bf16.mxu1 %v754_v1  ;;  %v320_v6 = vunpack.c.l.s4 %v880_v5  ;;  %v762_v8 = vld [vmem:[#allocation2] sm:$0xff]   ;;  %v922_v10 = vshrl.u32 %v315_v4, 7  ;;  %v759_v14 = vld [vmem:[#allocation5 + $0x10] sm:$0xff]   ;;  %v760_v24 = vld [vmem:[#allocation5 + $0x8] sm:$0xff]  }
  0x20   :  { %694 = vmatpush3.bf16.msra.mxu0 %v754_v1  ;;  %733 = vmatpush3.bf16.msra.mxu1 %v754_v1  ;;  %v763_v9 = vld [vmem:[#allocation2 + $0x20] sm:$0xff]   ;;  %v764_v40 = vld [vmem:[#allocation2 + $0x8] sm:$0xff]   ;;  %v766_v42 = vld [vmem:[#allocation2 + $0x10] sm:$0xff]  }
  0x21   :  { %695 = vmatprep.subr.bf16.mxu0 %v755_v2  ;;  %726 = vmatprep.subr.bf16.mxu1 %v755_v2  ;;  %v321_v11 = vunpack.c.0.s8 %v320_v6  ;;  %v314_v15 = vld [vmem:[%s1078_s3] sm:$0xff]  ;;  %v369_v19 = vsub.s32 0, %v922_v10  ;;  %v765_v41 = vld [vmem:[#allocation2 + $0x28] sm:$0xff]   ;;  %v767_v43 = vld [vmem:[#allocation2 + $0x30] sm:$0xff]   ;;  %v932_v52 = vadd.s32 8, %v922_v10 }
  0x22   :  { %709 = vmatprep.mubr.bf16.mxu0 %v762_v8  ;;  %717 = vmatprep.mubr.bf16.mxu1 %v763_v9  ;;  %vm471_vm0 = vcmp.gt.s32.totalorder %v314_v15, 1  ;;  %v318_v16 = vcombine.high %v314_v15, %v314_v15  ;;  %v761_v31 = vld [vmem:[#allocation5] sm:$0xff]   ;;  %v768_v46 = vld [vmem:[#allocation2 + $0x18] sm:$0xff]  }
  0x23   :  { %v324_v13 = vsub.s32 %v321_v11, %v922_v10  ;;  %v472_v18 = vsel %vm471_vm0, %v314_v15, 1  ;;  %v769_v47 = vld [vmem:[#allocation2 + $0x38] sm:$0xff]   ;;  %v948_v61 = vld [vmem:[%s1077_s2] ss:$0 sm:$0xff]  ;;  %s882_s2 = smov [#allocation7]  }
  0x24   :  { %696 = vmatpush3.bf16.msra.mxu0 %v755_v2  ;;  %734 = vmatpush3.bf16.msra.mxu1 %v755_v2  ;;  %v473_v20 = vcvt.s32.f32 %v472_v18  ;;  %s617_s6 = sshll.u32 %s882_s2, 4  ;;  %s618_s6 = int_to_ptr.vmem [resolvable:$true] %s617_s6 }
  0x25   :  { %697 = vmatprep.subr.bf16.mxu0 %v756_v3  ;;  %727 = vmatprep.subr.bf16.mxu1 %v756_v3  ;;  %v325_v17 = vrot.slane %v314_v15, %v324_v13  ;;  %v332_v23 = vrot.slane %v318_v16, %v324_v13  ;;  %s827_s7 = scalar_lea.vmem %s618_s6, 2048  ;;  %p832_p11 = scmp.lt.s32.totalorder %s618_s6, %s618_s6 }
  0x26   :  { %548 = vperm.xlu0 %752, %v473_v20   ;;  %p828_p10 = scmp.ne.s32.totalorder %s618_s6, %s827_s7  ;;  %p833_p12 = scmp.lt.s32.totalorder %s827_s7, %s827_s7 }
  0x27   :  { %v333_v21 = vcombine.high %v325_v17, %v325_v17  ;;  %v341_v22 = vrot.slane %v325_v17, %v324_v13  ;;  %v348_v28 = vrot.slane %v332_v23, %v324_v13  ;;  %v334_v29 = vcombine.high %v332_v23, %v332_v23 }
  0x28   :  { %698 = vmatpush3.bf16.msra.mxu0 %v756_v3  ;;  %735 = vmatpush3.bf16.msra.mxu1 %v756_v3  ;;  %p834_p13 = por %p833_p12, %p832_p11 }
  0x29   :  { %699 = vmatprep.subr.bf16.mxu0 %v757_v7  ;;  %728 = vmatprep.subr.bf16.mxu1 %v757_v7  ;;  %v355_v25 = vrot.slane %v333_v21, %v324_v13  ;;  %v370_v26 = vrot.slane %v341_v22, %v369_v19  ;;  %v363_v27 = vcombine.high %v341_v22, %v341_v22 }
  0x2a   :  { %v386_v33 = vrot.slane %v348_v28, %v369_v19  ;;  %v362_v34 = vrot.slane %v334_v29, %v324_v13  ;;  %v364_v36 = vcombine.high %v348_v28, %v348_v28  ;;  %p835_p0 = pnand %p834_p13, %p828_p10 }
  0x2b   :  { %v374_v30 = vrot.slane %v355_v25, %v369_v19  ;;  %v378_v32 = vrot.slane %v363_v27, %v369_v19  ;;  %400 = vperm.xlu1 %753, %v370_v26   ;;  %v365_v35 = vcombine.high %v355_v25, %v355_v25 }
  0x2c   :  { %700 = vmatpush3.bf16.msra.mxu0 %v757_v7  ;;  %736 = vmatpush3.bf16.msra.mxu1 %v757_v7  ;;  %v390_v37 = vrot.slane %v362_v34, %v369_v19  ;;  %v366_v39 = vcombine.high %v362_v34, %v362_v34  ;;  %v394_v45 = vrot.slane %v364_v36, %v369_v19 }
  0x2d   :  { %701 = vmatprep.subr.bf16.mxu0 %v758_v12  ;;  %729 = vmatprep.subr.bf16.mxu1 %v758_v12  ;;  %v382_v38 = vrot.slane %v365_v35, %v369_v19 }
  0x2e   :  { %403 = vperm.xlu0 %752, %v374_v30   ;;  %v398_v44 = vrot.slane %v366_v39, %v369_v19 }
  0x2f   :  { %412 = vperm.xlu1 %753, %v386_v33  }
  0x30   :  { %702 = vmatpush3.bf16.msra.mxu0 %v758_v12  ;;  %737 = vmatpush3.bf16.msra.mxu1 %v758_v12 }
  0x31   :  { %703 = vmatprep.subr.bf16.mxu0 %v759_v14  ;;  %730 = vmatprep.subr.bf16.mxu1 %v759_v14 }
  0x32   :  { %406 = vperm.xlu0 %752, %v378_v32  }
  0x33   :  { %409 = vperm.xlu1 %753, %v382_v38  }
  0x34   :  { %704 = vmatpush3.bf16.msra.mxu0 %v759_v14  ;;  %738 = vmatpush3.bf16.msra.mxu1 %v759_v14 }
  0x35   :  { %705 = vmatprep.subr.bf16.mxu0 %v760_v24  ;;  %731 = vmatprep.subr.bf16.mxu1 %v760_v24 }
  0x36   :  { %415 = vperm.xlu0 %752, %v390_v37  }
  0x37   :  { %418 = vperm.xlu1 %753, %v394_v45  }
  0x38   :  { %706 = vmatpush3.bf16.msra.mxu0 %v760_v24  ;;  %739 = vmatpush3.bf16.msra.mxu1 %v760_v24 }
  0x39   :  { %707 = vmatprep.subr.bf16.mxu0 %v761_v31  ;;  %732 = vmatprep.subr.bf16.mxu1 %v761_v31 }
  0x3a   :  { %421 = vperm.xlu0 %752, %v398_v44  }
  0x3c   :  { %708 = vmatpush3.bf16.msra.mxu0 %v761_v31  ;;  %740 = vmatpush3.bf16.msra.mxu1 %v761_v31 }
  0x3f   :  { %710 = vmatmul.mubr.bf16.vlgmr.msra.gmra.mxu0 %v764_v40  ;;  %718 = vmatmul.mubr.bf16.vlgmr.msra.gmra.mxu1 %v765_v41 }
  0x40   :  { %713 = vmatprep.mubr.bf16.mxu0 %v766_v42  ;;  %721 = vmatprep.mubr.bf16.mxu1 %v767_v43 }
  0x47   :  { %714 = vmatmul.mubr.bf16.gmra.mxu0 %v768_v46  ;;  %722 = vmatmul.mubr.bf16.gmra.mxu1 %v769_v47 }
  0xa1   :  { %v929_v48 = vpop.permute.xlu0 %548 }
  0xa2   :  { %v550_v53 = vrot.slane %v929_v48, 1  ;;  %v551_v54 = vrot.slane %v929_v48, 2  ;;  %v552_v55 = vrot.slane %v929_v48, 3  ;;  %771 = vrcp.f32 %v929_v48 }
  0xa3   :  { %v553_v58 = vrot.slane %v929_v48, 4  ;;  %v554_v59 = vrot.slane %v929_v48, 5  ;;  %v555_v60 = vrot.slane %v929_v48, 6  ;;  %v556_v62 = vrot.slane %v929_v48, 7 }
  0xa4   :  { %773 = vrcp.f32 %v550_v53 }
  0xa5   :  { %775 = vrcp.f32 %v551_v54 }
  0xa6   :  { %v401_v50 = vpop.permute.xlu1 %400  ;;  %777 = vrcp.f32 %v552_v55 }
  0xa7   :  { %vm423_vm3 = vcmp.lt.s32.totalorder %v922_v10, %v401_v50  ;;  %vm424_vm4 = vcmp.lt.s32.totalorder %v932_v52, %v401_v50  ;;  %779 = vrcp.f32 %v553_v58 }
  0xa8   :  { %v661_v2 = vsel %vm423_vm3, 1.0, %v881_v63  ;;  %v957_v3 = vsel %vm424_vm4, 1.0, %v881_v63 }
  0xa9   :  { %v404_v49 = vpop.permute.xlu0 %403 }
  0xaa   :  { %v413_v56 = vpop.permute.xlu1 %412  ;;  %vm425_vm1 = vcmp.lt.s32.totalorder %v922_v10, %v404_v49  ;;  %vm426_vm2 = vcmp.lt.s32.totalorder %v932_v52, %v404_v49 }
  0xab   :  { %v663_v0 = vsel %vm425_vm1, 1.0, %v881_v63  ;;  %v953_v1 = vsel %vm426_vm2, 1.0, %v881_v63  ;;  %vm431_vm7 = vcmp.lt.s32.totalorder %v922_v10, %v413_v56  ;;  %vm432_vm8 = vcmp.lt.s32.totalorder %v932_v52, %v413_v56 }
  0xac   :  { %v669_v19 = vsel %vm431_vm7, 1.0, %v881_v63  ;;  %v670_v20 = vsel %vm432_vm8, 1.0, %v881_v63 }
  0xad   :  { %v407_v51 = vpop.permute.xlu0 %406 }
  0xae   :  { %vm427_vm5 = vcmp.lt.s32.totalorder %v922_v10, %v407_v51  ;;  %vm428_vm6 = vcmp.lt.s32.totalorder %v932_v52, %v407_v51  ;;  %v410_v8 = vpop.permute.xlu1 %409 }
  0xaf   :  { %vm429_vm11 = vcmp.lt.s32.totalorder %v922_v10, %v410_v8  ;;  %vm430_vm12 = vcmp.lt.s32.totalorder %v932_v52, %v410_v8  ;;  %v976_v17 = vsel %vm427_vm5, 1.0, %v881_v63  ;;  %v981_v18 = vsel %vm428_vm6, 1.0, %v881_v63  ;;  %v1013_v41 = vpop.eup %771 }
  0xb0   :  { %v998_v27 = vsel %vm429_vm11, 1.0, %v881_v63  ;;  %v1003_v28 = vsel %vm430_vm12, 1.0, %v881_v63 }
  0xb1   :  { %v416_v57 = vpop.permute.xlu0 %415  ;;  %v1019_v47 = vpop.eup %773 }
  0xb2   :  { %vm433_vm9 = vcmp.lt.s32.totalorder %v922_v10, %v416_v57  ;;  %vm434_vm10 = vcmp.lt.s32.totalorder %v932_v52, %v416_v57  ;;  %v1015_v44 = vpop.permute.xlu1 %418  ;;  %v1022_v56 = vpop.eup %775 }
  0xb3   :  { %v671_v23 = vsel %vm433_vm9, 1.0, %v881_v63  ;;  %v672_v24 = vsel %vm434_vm10, 1.0, %v881_v63  ;;  %vm435_vm15 = vcmp.lt.s32.totalorder %v922_v10, %v1015_v44  ;;  %vm436_vm0 = vcmp.lt.s32.totalorder %v932_v52, %v1015_v44 }
  0xb5   :  { %v971_v16 = vpop.permute.xlu0 %421 }
  0xb6   :  { %vm437_vm13 = vcmp.lt.s32.totalorder %v922_v10, %v971_v16  ;;  %vm438_vm14 = vcmp.lt.s32.totalorder %v932_v52, %v971_v16 }
  0xff   :  { %v711_v4 = vpop.f32.mrf.mxu0  ;;  %v719_v5 = vpop.f32.mrf.mxu1 }
 0x100   :  { %v228_v6 = vadd.f32 %v711_v4, %v948_v61  ;;  %v260_v7 = vadd.f32 %v719_v5, %v948_v61 }
 0x101   :  { %v219_v9 = vpop.f32.mrf.mxu0  ;;  %v251_v11 = vpop.f32.mrf.mxu1 }
 0x102   :  { %v284_v12 = vmax.f32 %v228_v6, 0.0  ;;  %v292_v13 = vmax.f32 %v260_v7, 0.0  ;;  %v220_v14 = vadd.f32 %v948_v61, %v219_v9  ;;  %v252_v15 = vadd.f32 %v948_v61, %v251_v11  ;;  %v1025_v6 = vpop.eup %777 }
 0x103   :  { %v712_v21 = vpop.f32.mrf.mxu0  ;;  %v720_v22 = vpop.f32.mrf.mxu1 }
 0x104   :  { %300 = vst [vmem:[#allocation7 + $0x10] sm:$0xff] %v284_v12  ;;  %308 = vst [vmem:[#allocation7 + $0x50] sm:$0xff] %v292_v13  ;;  %v282_v25 = vmax.f32 %v220_v14, 0.0  ;;  %v290_v26 = vmax.f32 %v252_v15, 0.0  ;;  %v231_v29 = vadd.f32 %v712_v21, %v948_v61  ;;  %v263_v30 = vadd.f32 %v720_v22, %v948_v61 }
 0x105   :  { %v222_v31 = vpop.f32.mrf.mxu0  ;;  %v254_v32 = vpop.f32.mrf.mxu1  ;;  %v476_v35 = vmul.f32 %v663_v0, %v284_v12  ;;  %v484_v36 = vmul.f32 %v671_v23, %v292_v13 }
 0x106   :  { %298 = vst [vmem:[#allocation7] sm:$0xff] %v282_v25  ;;  %306 = vst [vmem:[#allocation7 + $0x40] sm:$0xff] %v290_v26  ;;  %v223_v33 = vadd.f32 %v948_v61, %v222_v31  ;;  %v255_v34 = vadd.f32 %v948_v61, %v254_v32  ;;  %v285_v37 = vmax.f32 %v231_v29, 0.0  ;;  %v293_v38 = vmax.f32 %v263_v30, 0.0 }
 0x107   :  { %v715_v39 = vpop.f32.mrf.mxu0  ;;  %v723_v40 = vpop.f32.mrf.mxu1  ;;  %v474_v49 = vmul.f32 %v661_v2, %v282_v25  ;;  %v482_v50 = vmul.f32 %v669_v19, %v290_v26  ;;  %v675_v29 = vsel %vm437_vm13, 1.0, %v881_v63  ;;  %v676_v30 = vsel %vm438_vm14, 1.0, %v881_v63 }
 0x108   :  { %v283_v42 = vmax.f32 %v223_v33, 0.0  ;;  %v291_v43 = vmax.f32 %v255_v34, 0.0  ;;  %v244_v45 = vadd.f32 %v715_v39, %v948_v61  ;;  %v276_v46 = vadd.f32 %v723_v40, %v948_v61  ;;  %301 = vst [vmem:[#allocation7 + $0x18] sm:$0xff] %v285_v37  ;;  %309 = vst [vmem:[#allocation7 + $0x58] sm:$0xff] %v293_v38 }
 0x109   :  { %v477_v51 = vmul.f32 %v953_v1, %v285_v37  ;;  %v485_v53 = vmul.f32 %v672_v24, %v293_v38  ;;  %v235_v54 = vpop.f32.mrf.mxu0  ;;  %v267_v55 = vpop.f32.mrf.mxu1  ;;  %v673_v31 = vsel %vm435_vm15, 1.0, %v881_v63 }
 0x10a   :  { %299 = vst [vmem:[#allocation7 + $0x8] sm:$0xff] %v283_v42  ;;  %v475_v57 = vmul.f32 %v957_v3, %v283_v42  ;;  %307 = vst [vmem:[#allocation7 + $0x48] sm:$0xff] %v291_v43  ;;  %v483_v0 = vmul.f32 %v670_v20, %v291_v43  ;;  %v288_v4 = vmax.f32 %v244_v45, 0.0  ;;  %v296_v5 = vmax.f32 %v276_v46, 0.0 }
 0x10b   :  { %v497_v2 = vadd.f32 %v477_v51, %v476_v35  ;;  %v525_v7 = vadd.f32 %v485_v53, %v484_v36  ;;  %v236_v8 = vadd.f32 %v948_v61, %v235_v54  ;;  %v268_v1 = vadd.f32 %v948_v61, %v267_v55  ;;  %v716_v9 = vpop.f32.mrf.mxu0  ;;  %v724_v11 = vpop.f32.mrf.mxu1 }
 0x10c   :  { %v490_v12 = vadd.f32 %v475_v57, %v474_v49  ;;  %v518_v13 = vadd.f32 %v483_v0, %v482_v50  ;;  %304 = vst [vmem:[#allocation7 + $0x30] sm:$0xff] %v288_v4  ;;  %312 = vst [vmem:[#allocation7 + $0x70] sm:$0xff] %v296_v5  ;;  %v247_v22 = vadd.f32 %v716_v9, %v948_v61 }
 0x10d   :  { %v498_v3 = vrot.slane %v497_v2, 4  ;;  %v526_v14 = vrot.slane %v525_v7, 4  ;;  %v286_v15 = vmax.f32 %v236_v8, 0.0  ;;  %v294_v19 = vmax.f32 %v268_v1, 0.0  ;;  %v238_v24 = vpop.f32.mrf.mxu0  ;;  %v270_v25 = vpop.f32.mrf.mxu1 }
 0x10e   :  { %v491_v20 = vrot.slane %v490_v12, 4  ;;  %v519_v21 = vrot.slane %v518_v13, 4  ;;  %v279_v23 = vadd.f32 %v724_v11, %v948_v61  ;;  %v480_v33 = vmul.f32 %v998_v27, %v288_v4 }
 0x10f   :  { %v499_v26 = vadd.f32 %v498_v3, %v497_v2  ;;  %302 = vst [vmem:[#allocation7 + $0x20] sm:$0xff] %v286_v15  ;;  %310 = vst [vmem:[#allocation7 + $0x60] sm:$0xff] %v294_v19  ;;  %v289_v34 = vmax.f32 %v247_v22, 0.0  ;;  %v239_v38 = vadd.f32 %v948_v61, %v238_v24  ;;  %v271_v16 = vadd.f32 %v948_v61, %v270_v25 }
 0x110   :  { %v492_v32 = vadd.f32 %v491_v20, %v490_v12  ;;  %v297_v35 = vmax.f32 %v279_v23, 0.0  ;;  %v520_v37 = vadd.f32 %v519_v21, %v518_v13  ;;  %v527_v39 = vadd.f32 %v526_v14, %v525_v7 }
 0x111   :  { %v500_v36 = vrot.slane %v499_v26, 2  ;;  %v488_v40 = vmul.f32 %v675_v29, %v296_v5  ;;  %305 = vst [vmem:[#allocation7 + $0x38] sm:$0xff] %v289_v34  ;;  %v481_v10 = vmul.f32 %v1003_v28, %v289_v34  ;;  %v674_v27 = vsel %vm436_vm0, 1.0, %v881_v63 }
 0x112   :  { %313 = vst [vmem:[#allocation7 + $0x78] sm:$0xff] %v297_v35  ;;  %v489_v42 = vmul.f32 %v676_v30, %v297_v35  ;;  %v478_v43 = vmul.f32 %v976_v17, %v286_v15  ;;  %v287_v45 = vmax.f32 %v239_v38, 0.0  ;;  %v295_v46 = vmax.f32 %v271_v16, 0.0 }
 0x113   :  { %v501_v49 = vadd.f32 %v500_v36, %v499_v26  ;;  %v493_v50 = vrot.slane %v492_v32, 2  ;;  %v511_v61 = vadd.f32 %v481_v10, %v480_v33  ;;  %v521_v53 = vrot.slane %v520_v37, 2 }
 0x114   :  { %v539_v51 = vadd.f32 %v489_v42, %v488_v40  ;;  %v486_v54 = vmul.f32 %v673_v31, %v294_v19  ;;  %303 = vst [vmem:[#allocation7 + $0x28] sm:$0xff] %v287_v45  ;;  %v479_v28 = vmul.f32 %v981_v18, %v287_v45  ;;  %311 = vst [vmem:[#allocation7 + $0x68] sm:$0xff] %v295_v46  ;;  %v528_v52 = vrot.slane %v527_v39, 2 }
 0x115   :  { %v487_v55 = vmul.f32 %v674_v27, %v295_v46  ;;  %v512_v63 = vrot.slane %v511_v61, 4 }
 0x116   :  { %v540_v17 = vrot.slane %v539_v51, 4 }
 0x117   :  { %838 = shalt.err (!%p835_p0)
}
 0x118   :  { %s883_s8 = smov 128   ;;  %s884_s9 = smov 8   ;;  %781 = vrcp.f32 %v554_v59  ;;  %v504_v58 = vadd.f32 %v479_v28, %v478_v43  ;;  %v532_v18 = vadd.f32 %v487_v55, %v486_v54  ;;  %v502_v44 = vrot.slane %v501_v49, 1 }
 0x119   :  { %623 = dma.vmem_to_hbm [thread:$0]  %s618_s6, 2048, %s1079_s4, [#allocation4], %s883_s8, %s883_s8, %s884_s9   ;;  %v494_v57 = vadd.f32 %v493_v50, %v492_v32  ;;  %v513_v0 = vadd.f32 %v512_v63, %v511_v61  ;;  %v541_v4 = vadd.f32 %v540_v17, %v539_v51  ;;  %783 = vrcp.f32 %v555_v60  ;;  %v780_v32 = vpop.eup %779 }
 0x11a   :  { %v522_v5 = vadd.f32 %v521_v53, %v520_v37  ;;  %v505_v2 = vrot.slane %v504_v58, 4  ;;  %v533_v7 = vrot.slane %v532_v18, 4  ;;  %785 = vrcp.f32 %v556_v62  ;;  %s885_s4 = smov [#allocation8]  }
 0x11b   :  { %v529_v8 = vadd.f32 %v528_v52, %v527_v39  ;;  %v514_v1 = vrot.slane %v513_v0, 2  ;;  %v542_v9 = vrot.slane %v541_v4, 2  ;;  %v503_v12 = vadd.f32 %v502_v44, %v501_v49  ;;  %s630_s12 = sshll.u32 %s885_s4, 4  ;;  %s631_s12 = int_to_ptr.vmem [resolvable:$true] %s630_s12 }
 0x11c   :  { %v506_v11 = vadd.f32 %v505_v2, %v504_v58  ;;  %v534_v59 = vadd.f32 %v533_v7, %v532_v18  ;;  %v495_v13 = vrot.slane %v494_v57, 1  ;;  %v523_v15 = vrot.slane %v522_v5, 1  ;;  %s847_s13 = scalar_lea.vmem %s631_s12, 128  ;;  %p852_p2 = scmp.lt.s32.totalorder %s631_s12, %s631_s12 }
 0x11d   :  { %v515_v3 = vadd.f32 %v514_v1, %v513_v0  ;;  %v543_v14 = vadd.f32 %v542_v9, %v541_v4  ;;  %v530_v21 = vrot.slane %v529_v8, 1  ;;  %v568_v24 = vmul.f32 %v1019_v47, %v503_v12  ;;  %p848_p1 = scmp.ne.s32.totalorder %s631_s12, %s847_s13  ;;  %p853_p3 = scmp.lt.s32.totalorder %s847_s13, %s847_s13 }
 0x11e   :  { %v507_v19 = vrot.slane %v506_v11, 2  ;;  %v535_v20 = vrot.slane %v534_v59, 2  ;;  %v496_v48 = vadd.f32 %v495_v13, %v494_v57  ;;  %v524_v26 = vadd.f32 %v523_v15, %v522_v5 }
 0x11f   :  { %v516_v60 = vrot.slane %v515_v3, 1  ;;  %v544_v25 = vrot.slane %v543_v14, 1  ;;  %v531_v31 = vadd.f32 %v530_v21, %v529_v8  ;;  %v589_v36 = vrot.slane %v568_v24, 7  ;;  %p854_p4 = por %p853_p3, %p852_p2 }
 0x120   :  { %v508_v22 = vadd.f32 %v507_v19, %v506_v11  ;;  %v536_v23 = vadd.f32 %v535_v20, %v534_v59  ;;  %v566_v37 = vmul.f32 %v1013_v41, %v496_v48  ;;  %v574_v39 = vmul.f32 %v780_v32, %v524_v26 }
 0x121   :  { %v517_v62 = vadd.f32 %v516_v60, %v515_v3  ;;  %v545_v16 = vadd.f32 %v544_v25, %v543_v14  ;;  %vm590_vm1 = vcmask 1041409   ;;  %vm593_vm2 = vcmask 1042434   ;;  %p855_p5 = pnand %p854_p4, %p848_p1 }
 0x122   :  { %v509_v29 = vrot.slane %v508_v22, 1  ;;  %v537_v30 = vrot.slane %v536_v23, 1  ;;  %vm596_vm3 = vcmask 1043459   ;;  %v591_v49 = vsel %vm590_vm1, %v589_v36, %v566_v37 }
 0x123   :  { %v572_v38 = vmul.f32 %v1025_v6, %v517_v62  ;;  %vm599_vm4 = vcmask 1044484   ;;  %v598_v50 = vrot.slane %v574_v39, 4  ;;  %vm602_vm5 = vcmask 1045509  }
 0x124   :  { %v510_v33 = vadd.f32 %v509_v29, %v508_v22  ;;  %v538_v34 = vadd.f32 %v537_v30, %v536_v23  ;;  %vm605_vm6 = vcmask 1046534   ;;  %vm608_vm7 = vcmask 1047559  }
 0x125   :  { %v782_v35 = vpop.eup %781  ;;  %v595_v45 = vrot.slane %v572_v38, 5 }
 0x126   :  { %v570_v47 = vmul.f32 %v1022_v56, %v510_v33  ;;  %v784_v40 = vpop.eup %783  ;;  %v576_v10 = vmul.f32 %v782_v35, %v531_v31 }
 0x127   :  { %v786_v42 = vpop.eup %785  ;;  %v578_v43 = vmul.f32 %v784_v40, %v538_v34 }
 0x128   :  { %v592_v27 = vrot.slane %v570_v47, 6  ;;  %v580_v46 = vmul.f32 %v786_v42, %v545_v16  ;;  %v601_v61 = vrot.slane %v576_v10, 3 }
 0x129   :  { %v604_v51 = vrot.slane %v578_v43, 2 }
 0x12a   :  { %v594_v41 = vsel %vm593_vm2, %v592_v27, %v591_v49  ;;  %v607_v54 = vrot.slane %v580_v46, 1 }
 0x12b   :  { %v597_v6 = vsel %vm596_vm3, %v595_v45, %v594_v41 }
 0x12c   :  { %v600_v56 = vsel %vm599_vm4, %v598_v50, %v597_v6 }
 0x12d   :  { %v603_v53 = vsel %vm602_vm5, %v601_v61, %v600_v56 }
 0x12e   :  { %v606_v28 = vsel %vm605_vm6, %v604_v51, %v603_v53 }
 0x12f   :  { %v609_v55 = vsel %vm608_vm7, %v607_v54, %v606_v28 }
 0x130   :  { %611 = vst [vmem:[#allocation8] sm:$0xff] %v609_v55 }
 0x131   :  { %858 = shalt.err (!%p855_p5)
}
 0x132   :  { %633 = dma.vmem_to_hbm [thread:$0]  %s631_s12, 128, %s1080_s5, [#allocation9]  }
 0x133   :  { %871 = dma.done.wait [#allocation4], 2048  }
 0x134   :  { %872 = vsyncadd [#allocation4], 4294965248 }
 0x135   :  { %873 = dma.done.wait [#allocation9], 128  }
 0x136   :  { %874 = vsyncadd [#allocation9], 4294967168 }
 0x137   :  { %640 = vsyncpa [#allocation3], 1 }
 0x138   :  { %641 = vsyncpa [#allocation6], 1 }
 0x139   :  { %642 = vsyncpa [#allocation4], 1 }
 0x13a   :  { %643 = vsyncpa [#allocation9], 1 }

</bundles_post_ra>
